<compile_context>
chip_gen: v5e
topology: v5e:2x2
jax: 0.10.0
libtpu: 0.0.40
codegen_flags: <defaults>
</compile_context>

<pallas_src>
import jax
import jax.numpy as jnp
from jax.experimental import pallas as pl
from jax.experimental.pallas import tpu as pltpu

_NEG_BIG = -1e30  # finite "-inf": keeps exp(m_old - m_new) well-defined in the online LSE


def _round_up(x, m):
    return ((x + m - 1) // m) * m


def _make_kernel(nv, vocab_size, vtile, has_vocab_tail):
    """Builds the per-token-tile online masked cross-entropy kernel.

    Grid: (token_tiles, vocab_tiles); vocab axis is the reduction ("arbitrary").
      blk_ref/flag_ref : (nt,) int32 scalar-prefetch tables (dedup block index / any-valid)
      pred_ref : (tile, vtile) logits chunk in native dtype (bf16 ok; upcast only for exp)
      tgt_ref  : (tile, 1) int32 targets; -1 marks padded / invalid tokens
      out_ref  : (1, 8, 128) f32 partials; sublane 0 = sum_nll, sublane 1 = count
      m_sc/l_sc/hit_sc : (tile, 1) f32 running max / sum-exp / target-logit
    """
    last_vk = nv - 1

    def kernel(blk_ref, flag_ref, pred_ref, tgt_ref, out_ref, m_sc, l_sc, hit_sc):
        i = pl.program_id(0)
        vk = pl.program_id(1)
        tile_valid = flag_ref[i] > 0

        @pl.when(tile_valid)
        def _compute():
            @pl.when(vk == 0)
            def _init():
                m_sc[...] = jnp.full(m_sc.shape, _NEG_BIG, dtype=m_sc.dtype)
                l_sc[...] = jnp.zeros_like(l_sc)
                hit_sc[...] = jnp.zeros_like(hit_sc)

            logits = pred_ref[...]                      # native dtype (bf16 streams fine)
            rows, cols = logits.shape
            tgt = tgt_ref[...]                          # (rows, 1) int32; -1 == padded
            # Local iota + shifted target: avoids a full-block "+ vk*vtile" integer add.
            local_ids = jax.lax.broadcasted_iota(jnp.int32, (rows, cols), 1)
            tgt_local = tgt - vk * cols

            if has_vocab_tail:
                lane_ok = local_ids < (vocab_size - vk * cols)
                logits_for_max = jnp.where(
                    lane_ok, logits, jnp.asarray(_NEG_BIG, dtype=logits.dtype))
            else:
                logits_for_max = logits

            # Online log-sum-exp; max runs in the native dtype (exact), exp in f32.
            m_new = jnp.maximum(
                m_sc[...],
                jnp.max(logits_for_max, axis=-1, keepdims=True).astype(jnp.float32))
            alpha = jnp.exp(m_sc[...] - m_new)
            e = jnp.exp(logits.astype(jnp.float32) - m_new)
            if has_vocab_tail:
                e = jnp.where(lane_ok, e, 0.0)
            # TODO(synk): if profiling shows XLU saturating on v7x, fold these two lane
            # reductions into an MXU dot against an all-ones (vtile, 128) operand.
            l_sc[...] = alpha * l_sc[...] + jnp.sum(e, axis=-1, keepdims=True)
            m_sc[...] = m_new

            # Select-reduce gather of the target logit (tgt == -1 never matches; compare
            # and select in native dtype, exact since all non-selected lanes are 0).
            picked = jnp.where(local_ids == tgt_local, logits, jnp.zeros_like(logits))
            hit_sc[...] += jnp.sum(picked, axis=-1, keepdims=True).astype(jnp.float32)

        @pl.when(vk == last_vk)
        def _finalize():
            out_ref[...] = jnp.zeros(out_ref.shape, out_ref.dtype)

            @pl.when(tile_valid)
            def _write():
                tgt = tgt_ref[...]
                lse = jnp.log(l_sc[...]) + m_sc[...]
                nll = lse - hit_sc[...]
                ok = tgt >= 0
                # jnp.where (not multiply) so NaN/garbage in padded / clipped rows can't leak.
                total = jnp.sum(jnp.where(ok, nll, 0.0))
                count = jnp.sum(ok.astype(jnp.float32))
                out_ref[0:1, 0:1, :] = jnp.full((1, 1, 128), total, dtype=jnp.float32)
                out_ref[0:1, 1:2, :] = jnp.full((1, 1, 128), count, dtype=jnp.float32)

    return kernel


def packed_cross_entropy_loss(predictions, targets, lengths, *,
                              token_tile=512, max_vocab_tile=4096):
    """predictions: (B, T, V) float (f32 or bf16 -- pass bf16 on v5e/v6e if acceptable);
    targets: (B, T) int; lengths: (B,) int (>= 1, as required by pack_padded_sequence)."""
    B, T, V = predictions.shape
    n_tok = B * T
    pred_flat = predictions.reshape(n_tok, V)   # NOT padded: edge block is a clipped DMA

    # Validity from lengths -> -1 sentinel targets (tiny wrapper compute).
    valid = jnp.arange(T, dtype=jnp.int32)[None, :] < lengths.astype(jnp.int32)[:, None]
    tgt_flat = jnp.where(valid, targets.astype(jnp.int32), -1).reshape(n_tok)

    # Degenerate tiny case: pad rows up to one sublane (negligible bytes).
    if n_tok < 8:
        pred_flat = jnp.pad(pred_flat, ((0, 8 - n_tok), (0, 0)))
        tgt_flat = jnp.pad(tgt_flat, (0, 8 - n_tok), constant_values=-1)
        n_tok = 8

    # --- vocab tiling: cdiv + in-kernel tail mask (works for any V) ---
    max_vocab_tile = max(128, (max_vocab_tile // 128) * 128)
    vtile = V if V <= max_vocab_tile else max_vocab_tile
    nv = -(-V // vtile)
    has_vocab_tail = (V % vtile) != 0

    # --- device-aware budgets (v7x: 64 MiB VMEM, compute-bound; v5e/v6e: 128 MiB, HBM-bound)
    try:
        kind = jax.devices()[0].device_kind.lower()
    except Exception:
        kind = ""
    is_v7 = ("v7" in kind) or ("7x" in kind)
    per_buf_budget = (4 if is_v7 else 8) * 1024 * 1024
    vmem_limit = (48 if is_v7 else 96) * 1024 * 1024

    # --- token tiling ---
    bytes_per_row = vtile * predictions.dtype.itemsize
    tile = min(token_tile, max(8, (per_buf_budget // bytes_per_row) // 8 * 8))
    if n_tok > 8:   # keep >= 2 token tiles so both v7x TensorCores get work
        tile = min(tile, _round_up(-(-n_tok // 2), 8))
    tile = max(8, min(tile, _round_up(n_tok, 8)))
    nt = -(-n_tok // tile)

    # Pad ONLY the tiny target vector (no full-logit HBM copy).
    n_pad = nt * tile - n_tok
    if n_pad:
        tgt_flat = jnp.pad(tgt_flat, (0, n_pad), constant_values=-1)
    tgt_2d = tgt_flat.reshape(nt * tile, 1)

    # Per-token-tile "any valid" flag + dedup block table: fully padded tiles re-request the
    # previous valid tile's (last) block so Pallas skips the re-DMA, and pl.when skips compute.
    tile_flag = jnp.any(tgt_flat.reshape(nt, tile) >= 0, axis=1).astype(jnp.int32)
    idx = jnp.arange(nt, dtype=jnp.int32)
    blk_tbl = jnp.maximum(
        jax.lax.cummax(jnp.where(tile_flag > 0, idx, -1), axis=0), 0).astype(jnp.int32)

    last_vk = nv - 1
    kernel = _make_kernel(nv, V, vtile, has_vocab_tail)

    grid_spec = pltpu.PrefetchScalarGridSpec(
        num_scalar_prefetch=2,
        grid=(nt, nv),
        in_specs=[
            # logits chunk; padded tiles repeat the previous tile's last chunk (dedup -> no DMA)
            pl.BlockSpec((tile, vtile),
                         lambda i, k, blk, flag: (blk[i], jnp.where(flag[i] > 0, k, last_vk))),
            # targets (fixed over the vocab axis)
            pl.BlockSpec((tile, 1), lambda i, k, blk, flag: (blk[i], 0)),
        ],
        out_specs=pl.BlockSpec((1, 8, 128), lambda i, k, blk, flag: (i, 0, 0)),
        scratch_shapes=[
            pltpu.VMEM((tile, 1), jnp.float32),   # running max m
            pltpu.VMEM((tile, 1), jnp.float32),   # running sum-exp l
            pltpu.VMEM((tile, 1), jnp.float32),   # target-logit accumulator
        ],
    )

    partials = pl.pallas_call(
        kernel,
        out_shape=jax.ShapeDtypeStruct((nt, 8, 128), jnp.float32),
        grid_spec=grid_spec,
        compiler_params=pltpu.CompilerParams(
            dimension_semantics=("parallel", "arbitrary"),
            vmem_limit_bytes=vmem_limit,
        ),
    )(blk_tbl, tile_flag, pred_flat, tgt_2d)

    total = jnp.sum(partials[:, 0, 0])
    count = jnp.sum(partials[:, 1, 0])
    return total / jnp.maximum(count, 1.0)   # guard against an all-padded (degenerate) input


def _reference_loss(predictions, targets, lengths):
    # pure-JAX reference of pack_padded_sequence + CrossEntropyLoss(mean)
    B, T, V = predictions.shape
    logp = jax.nn.log_softmax(predictions.astype(jnp.float32), axis=-1)
    nll = -jnp.take_along_axis(logp, targets[..., None].astype(jnp.int32), axis=-1)[..., 0]
    mask = (jnp.arange(T)[None, :] < lengths[:, None]).astype(jnp.float32)
    return jnp.sum(nll * mask) / jnp.sum(mask)


if __name__ == "__main__":
    key = jax.random.PRNGKey(0)
    k1, k2, k3, k4 = jax.random.split(key, 4)

    # Test 1: ragged token edge (B*T = 15 is not a multiple of the token tile).
    B, T, V = 3, 5, 128
    predictions = jax.random.normal(k1, (B, T, V), dtype=jnp.float32)
    targets = jax.random.randint(k2, (B, T), 0, V, dtype=jnp.int32)
    lengths = jnp.array([5, 4, 2], dtype=jnp.int32)   # descending, >= 1 (pack_padded_sequence)

    loss = packed_cross_entropy_loss(predictions, targets, lengths)
    jax.block_until_ready(loss)
    ref = _reference_loss(predictions, targets, lengths)
    assert jnp.allclose(loss, ref, rtol=1e-5, atol=1e-5), (loss, ref)

    # Test 2: vocab tiling with a tail chunk (V=200, vtile=128) + fully padded token tiles
    # (trailing tiles of sequence 1 are all padding -> exercises the dedup / pl.when gate).
    B, T, V = 2, 32, 200
    predictions = jax.random.normal(k3, (B, T, V), dtype=jnp.float32)
    targets = jax.random.randint(k4, (B, T), 0, V, dtype=jnp.int32)
    lengths = jnp.array([32, 4], dtype=jnp.int32)

    loss2 = packed_cross_entropy_loss(predictions, targets, lengths,
                                      token_tile=8, max_vocab_tile=128)
    jax.block_until_ready(loss2)
    ref2 = _reference_loss(predictions, targets, lengths)
    assert jnp.allclose(loss2, ref2, rtol=1e-5, atol=1e-5), (loss2, ref2)

    print("KERNEL_OK")
</pallas_src>

<mosaic_0001>
module attributes {stable_mosaic.version = 11 : i64} {
  func.func @kernel(%arg0: i32, %arg1: i32, %arg2: memref<2xi32, #tpu.memory_space<smem>>, %arg3: memref<2xi32, #tpu.memory_space<smem>>, %arg4: memref<8x128xf32, #tpu.memory_space<vmem>>, %arg5: memref<8x1xi32, #tpu.memory_space<vmem>>, %arg6: memref<1x8x128xf32, #tpu.memory_space<vmem>>, %arg7: memref<8x1xf32, #tpu.memory_space<vmem>>, %arg8: memref<8x1xf32, #tpu.memory_space<vmem>>, %arg9: memref<8x1xf32, #tpu.memory_space<vmem>>) attributes {dimension_semantics = [#tpu.dimension_semantics<parallel>, #tpu.dimension_semantics<arbitrary>], iteration_bounds = array<i64: 2, 1>, scalar_prefetch = 2 : i64, scratch_operands = 3 : i64, tpu.core_type = #tpu.core_type<tc>, window_params = [{transform_indices = @transform_0, window_bounds = array<i64: 8, 128>}, {transform_indices = @transform_1, window_bounds = array<i64: 8, 1>}, {transform_indices = @transform_2, window_bounds = array<i64: 1, 8, 128>}]} {
    %0 = arith.index_cast %arg0 : i32 to index
    %1 = memref.load %arg3[%0] : memref<2xi32, #tpu.memory_space<smem>>
    %c0_i32 = arith.constant 0 : i32
    %2 = arith.cmpi sgt, %1, %c0_i32 : i32
    %3 = arith.extui %2 : i1 to i32
    %c0_i32_0 = arith.constant 0 : i32
    %4 = arith.cmpi ne, %3, %c0_i32_0 : i32
    scf.if %4 {
      %c0_i32_3 = arith.constant 0 : i32
      %8 = arith.cmpi eq, %arg1, %c0_i32_3 : i32
      %9 = arith.extui %8 : i1 to i32
      %c0_i32_4 = arith.constant 0 : i32
      %10 = arith.cmpi ne, %9, %c0_i32_4 : i32
      scf.if %10 {
        %cst_25 = arith.constant -1.000000e+30 : f32
        %43 = vector.broadcast %cst_25 : f32 to vector<8x1xf32>
        %c0_26 = arith.constant 0 : index
        %c0_27 = arith.constant 0 : index
        %44 = vector.load %arg7[%c0_26, %c0_27] : memref<8x1xf32, #tpu.memory_space<vmem>>, vector<8x1xf32>
        tpu.vector_store %arg7[%c0_26, %c0_27], %43 {strides = array<i32>} : memref<8x1xf32, #tpu.memory_space<vmem>>, vector<8x1xf32>,
        %cst_28 = arith.constant 0.000000e+00 : f32
        %45 = vector.broadcast %cst_28 : f32 to vector<8x1xf32>
        %c0_29 = arith.constant 0 : index
        %c0_30 = arith.constant 0 : index
        %46 = vector.load %arg8[%c0_29, %c0_30] : memref<8x1xf32, #tpu.memory_space<vmem>>, vector<8x1xf32>
        tpu.vector_store %arg8[%c0_29, %c0_30], %45 {strides = array<i32>} : memref<8x1xf32, #tpu.memory_space<vmem>>, vector<8x1xf32>,
        %cst_31 = arith.constant 0.000000e+00 : f32
        %47 = vector.broadcast %cst_31 : f32 to vector<8x1xf32>
        %c0_32 = arith.constant 0 : index
        %c0_33 = arith.constant 0 : index
        %48 = vector.load %arg9[%c0_32, %c0_33] : memref<8x1xf32, #tpu.memory_space<vmem>>, vector<8x1xf32>
        tpu.vector_store %arg9[%c0_32, %c0_33], %47 {strides = array<i32>} : memref<8x1xf32, #tpu.memory_space<vmem>>, vector<8x1xf32>,
      } else {
      }
      %c0 = arith.constant 0 : index
      %c0_5 = arith.constant 0 : index
      %11 = vector.load %arg4[%c0, %c0_5] : memref<8x128xf32, #tpu.memory_space<vmem>>, vector<8x128xf32>
      %c0_6 = arith.constant 0 : index
      %c0_7 = arith.constant 0 : index
      %12 = vector.load %arg5[%c0_6, %c0_7] : memref<8x1xi32, #tpu.memory_space<vmem>>, vector<8x1xi32>
      %13 = tpu.iota {dimensions = array<i32: 1>} : vector<8x128xi32>
      %c128_i32 = arith.constant 128 : i32
      %14 = arith.muli %arg1, %c128_i32 : i32
      %15 = vector.broadcast %14 : i32 to vector<8x1xi32>
      %16 = arith.subi %12, %15 : vector<8x1xi32>
      %c0_8 = arith.constant 0 : index
      %c0_9 = arith.constant 0 : index
      %17 = vector.load %arg7[%c0_8, %c0_9] : memref<8x1xf32, #tpu.memory_space<vmem>>, vector<8x1xf32>
      %cst = arith.constant dense<0xFF800000> : vector<8xf32>
      %18 = vector.multi_reduction <maximumf>, %11, %cst [1] : vector<8x128xf32> to vector<8xf32>
      %19 = vector.shape_cast %18 : vector<8xf32> to vector<8x1xf32>
      %20 = arith.maximumf %17, %19 : vector<8x1xf32>
      %c0_10 = arith.constant 0 : index
      %c0_11 = arith.constant 0 : index
      %21 = vector.load %arg7[%c0_10, %c0_11] : memref<8x1xf32, #tpu.memory_space<vmem>>, vector<8x1xf32>
      %22 = arith.subf %21, %20 : vector<8x1xf32>
      %23 = math.exp %22 : vector<8x1xf32>
      %24 = vector.broadcast %20 : vector<8x1xf32> to vector<8x128xf32>
      %25 = arith.subf %11, %24 : vector<8x128xf32>
      %26 = math.exp %25 : vector<8x128xf32>
      %c0_12 = arith.constant 0 : index
      %c0_13 = arith.constant 0 : index
      %27 = vector.load %arg8[%c0_12, %c0_13] : memref<8x1xf32, #tpu.memory_space<vmem>>, vector<8x1xf32>
      %28 = arith.mulf %23, %27 : vector<8x1xf32>
      %cst_14 = arith.constant dense<0.000000e+00> : vector<8xf32>
      %29 = vector.multi_reduction <add>, %26, %cst_14 [1] : vector<8x128xf32> to vector<8xf32>
      %30 = vector.shape_cast %29 : vector<8xf32> to vector<8x1xf32>
      %31 = arith.addf %28, %30 : vector<8x1xf32>
      %c0_15 = arith.constant 0 : index
      %c0_16 = arith.constant 0 : index
      %32 = vector.load %arg8[%c0_15, %c0_16] : memref<8x1xf32, #tpu.memory_space<vmem>>, vector<8x1xf32>
      tpu.vector_store %arg8[%c0_15, %c0_16], %31 {strides = array<i32>} : memref<8x1xf32, #tpu.memory_space<vmem>>, vector<8x1xf32>,
      %c0_17 = arith.constant 0 : index
      %c0_18 = arith.constant 0 : index
      %33 = vector.load %arg7[%c0_17, %c0_18] : memref<8x1xf32, #tpu.memory_space<vmem>>, vector<8x1xf32>
      tpu.vector_store %arg7[%c0_17, %c0_18], %20 {strides = array<i32>} : memref<8x1xf32, #tpu.memory_space<vmem>>, vector<8x1xf32>,
      %34 = vector.broadcast %16 : vector<8x1xi32> to vector<8x128xi32>
      %35 = arith.cmpi eq, %13, %34 : vector<8x128xi32>
      %cst_19 = arith.constant 0.000000e+00 : f32
      %36 = vector.broadcast %cst_19 : f32 to vector<8x128xf32>
      %37 = arith.select %35, %11, %36 : vector<8x128xi1>, vector<8x128xf32>
      %c0_20 = arith.constant 0 : index
      %c0_21 = arith.constant 0 : index
      %38 = vector.load %arg9[%c0_20, %c0_21] : memref<8x1xf32, #tpu.memory_space<vmem>>, vector<8x1xf32>
      %cst_22 = arith.constant dense<0.000000e+00> : vector<8xf32>
      %39 = vector.multi_reduction <add>, %37, %cst_22 [1] : vector<8x128xf32> to vector<8xf32>
      %40 = vector.shape_cast %39 : vector<8xf32> to vector<8x1xf32>
      %41 = arith.addf %38, %40 : vector<8x1xf32>
      %c0_23 = arith.constant 0 : index
      %c0_24 = arith.constant 0 : index
      %42 = vector.load %arg9[%c0_23, %c0_24] : memref<8x1xf32, #tpu.memory_space<vmem>>, vector<8x1xf32>
      tpu.vector_store %arg9[%c0_23, %c0_24], %41 {strides = array<i32>} : memref<8x1xf32, #tpu.memory_space<vmem>>, vector<8x1xf32>,
    } else {
    }
    %c0_i32_1 = arith.constant 0 : i32
    %5 = arith.cmpi eq, %arg1, %c0_i32_1 : i32
    %6 = arith.extui %5 : i1 to i32
    %c0_i32_2 = arith.constant 0 : i32
    %7 = arith.cmpi ne, %6, %c0_i32_2 : i32
    scf.if %7 {
      %cst = arith.constant 0.000000e+00 : f32
      %8 = vector.broadcast %cst : f32 to vector<1x8x128xf32>
      %c0 = arith.constant 0 : index
      %c0_3 = arith.constant 0 : index
      %c0_4 = arith.constant 0 : index
      %9 = vector.load %arg6[%c0, %c0_3, %c0_4] : memref<1x8x128xf32, #tpu.memory_space<vmem>>, vector<1x8x128xf32>
      tpu.vector_store %arg6[%c0, %c0_3, %c0_4], %8 {strides = array<i32>} : memref<1x8x128xf32, #tpu.memory_space<vmem>>, vector<1x8x128xf32>,
      %10 = arith.extui %2 : i1 to i32
      %c0_i32_5 = arith.constant 0 : i32
      %11 = arith.cmpi ne, %10, %c0_i32_5 : i32
      scf.if %11 {
        %c0_6 = arith.constant 0 : index
        %c0_7 = arith.constant 0 : index
        %12 = vector.load %arg5[%c0_6, %c0_7] : memref<8x1xi32, #tpu.memory_space<vmem>>, vector<8x1xi32>
        %c0_8 = arith.constant 0 : index
        %c0_9 = arith.constant 0 : index
        %13 = vector.load %arg8[%c0_8, %c0_9] : memref<8x1xf32, #tpu.memory_space<vmem>>, vector<8x1xf32>
        %14 = math.log %13 : vector<8x1xf32>
        %c0_10 = arith.constant 0 : index
        %c0_11 = arith.constant 0 : index
        %15 = vector.load %arg7[%c0_10, %c0_11] : memref<8x1xf32, #tpu.memory_space<vmem>>, vector<8x1xf32>
        %16 = arith.addf %14, %15 : vector<8x1xf32>
        %c0_12 = arith.constant 0 : index
        %c0_13 = arith.constant 0 : index
        %17 = vector.load %arg9[%c0_12, %c0_13] : memref<8x1xf32, #tpu.memory_space<vmem>>, vector<8x1xf32>
        %18 = arith.subf %16, %17 : vector<8x1xf32>
        %c0_i32_14 = arith.constant 0 : i32
        %19 = vector.broadcast %c0_i32_14 : i32 to vector<8x1xi32>
        %20 = arith.cmpi sge, %12, %19 : vector<8x1xi32>
        %cst_15 = arith.constant 0.000000e+00 : f32
        %21 = vector.broadcast %cst_15 : f32 to vector<8x1xf32>
        %22 = arith.select %20, %18, %21 : vector<8x1xi1>, vector<8x1xf32>
        %23 = vector.shape_cast %22 : vector<8x1xf32> to vector<1x8x1xf32>
        %cst_16 = arith.constant dense<0.000000e+00> : vector<1xf32>
        %24 = vector.multi_reduction <add>, %23, %cst_16 [1, 2] : vector<1x8x1xf32> to vector<1xf32>
        %25 = vector.shape_cast %24 : vector<1xf32> to vector<1x1x1xf32>
        %26 = vector.extract %25[0, 0, 0] : f32 from vector<1x1x1xf32>
        %27 = arith.extui %20 : vector<8x1xi1> to vector<8x1xi32>
        %28 = arith.sitofp %27 : vector<8x1xi32> to vector<8x1xf32>
        %29 = vector.shape_cast %28 : vector<8x1xf32> to vector<1x8x1xf32>
        %cst_17 = arith.constant dense<0.000000e+00> : vector<1xf32>
        %30 = vector.multi_reduction <add>, %29, %cst_17 [1, 2] : vector<1x8x1xf32> to vector<1xf32>
        %31 = vector.shape_cast %30 : vector<1xf32> to vector<1x1x1xf32>
        %32 = vector.extract %31[0, 0, 0] : f32 from vector<1x1x1xf32>
        %33 = vector.broadcast %26 : f32 to vector<1x1x128xf32>
        %c0_18 = arith.constant 0 : index
        %c0_19 = arith.constant 0 : index
        %c0_20 = arith.constant 0 : index
        %34 = vector.load %arg6[%c0_18, %c0_19, %c0_20] : memref<1x8x128xf32, #tpu.memory_space<vmem>>, vector<1x1x128xf32>
        tpu.vector_store %arg6[%c0_18, %c0_19, %c0_20], %33 {strides = array<i32>} : memref<1x8x128xf32, #tpu.memory_space<vmem>>, vector<1x1x128xf32>,
        %35 = vector.broadcast %32 : f32 to vector<1x1x128xf32>
        %c0_21 = arith.constant 0 : index
        %c1 = arith.constant 1 : index
        %c0_22 = arith.constant 0 : index
        %36 = vector.load %arg6[%c0_21, %c1, %c0_22] : memref<1x8x128xf32, #tpu.memory_space<vmem>>, vector<1x1x128xf32>
        tpu.vector_store %arg6[%c0_21, %c1, %c0_22], %35 {strides = array<i32>} : memref<1x8x128xf32, #tpu.memory_space<vmem>>, vector<1x1x128xf32>,
      } else {
      }
    } else {
    }
    return
  }
  func.func @transform_0(%arg0: i32, %arg1: i32, %arg2: memref<2xi32, #tpu.memory_space<smem>>, %arg3: memref<2xi32, #tpu.memory_space<smem>>) -> (i32, i32) {
    %0 = arith.index_cast %arg0 : i32 to index
    %1 = memref.load %arg2[%0] : memref<2xi32, #tpu.memory_space<smem>>
    %2 = arith.index_cast %arg0 : i32 to index
    %3 = memref.load %arg3[%2] : memref<2xi32, #tpu.memory_space<smem>>
    %c0_i32 = arith.constant 0 : i32
    %4 = arith.cmpi sgt, %3, %c0_i32 : i32
    %c0_i32_0 = arith.constant 0 : i32
    %5 = arith.select %4, %arg1, %c0_i32_0 : i32
    %c0_i32_1 = arith.constant 0 : i32
    return %1, %5 : i32, i32
  }
  func.func @transform_1(%arg0: i32, %arg1: i32, %arg2: memref<2xi32, #tpu.memory_space<smem>>, %arg3: memref<2xi32, #tpu.memory_space<smem>>) -> (i32, i32) {
    %0 = arith.index_cast %arg0 : i32 to index
    %1 = memref.load %arg2[%0] : memref<2xi32, #tpu.memory_space<smem>>
    %c0_i32 = arith.constant 0 : i32
    %c0_i32_0 = arith.constant 0 : i32
    return %1, %c0_i32 : i32, i32
  }
  func.func @transform_2(%arg0: i32, %arg1: i32, %arg2: memref<2xi32, #tpu.memory_space<smem>>, %arg3: memref<2xi32, #tpu.memory_space<smem>>) -> (i32, i32, i32) {
    %c0_i32 = arith.constant 0 : i32
    %c0_i32_0 = arith.constant 0 : i32
    %c0_i32_1 = arith.constant 0 : i32
    return %arg0, %c0_i32, %c0_i32_0 : i32, i32, i32
  }
}

</mosaic_0001>

<bundles_post_ra>
// kernel: tpu_custom_call.1
= control target key start
LH: loop header
LB: loop body
LE: loop exit
PB: predicated region body
PF: predicated region fallthrough
CT: control target
= control target key end

     0   :  { %s620_s21 = smov [#allocation6]   ;;  %s621_s22 = smov [#allocation7]   ;;  %s786_s0 = inlined_call_operand.vmem [shape: s32[2], index: 0, kind: input, shape index: {}]   ;;  %s787_s2 = inlined_call_operand.vmem [shape: f32[15,128], index: 2, kind: input, shape index: {}]   ;;  %s788_s3 = inlined_call_operand.vmem [shape: s32[16,1], index: 3, kind: input, shape index: {}]   ;;  %s789_s4 = inlined_call_operand.hbm [shape: f32[2,8,128], index: 4, kind: output, shape index: {}]   ;;  %s790_s1 = inlined_call_operand.hbm [shape: s32[2], index: 1, kind: input, shape index: {}]  }
   0x1   :  { %s10_s17 = sshll.u32 %s786_s0, 4  ;;  %s15_s20 = sshll.u32 %s790_s1, 4  ;;  %s11_s17 = int_to_ptr.vmem [resolvable:$true] %s10_s17  ;;  %s16_s20 = int_to_ptr.hbm [resolvable:$true] %s15_s20 }
   0x2   :  { %13 = dma.vmem_to_smem %s11_s17, 16, %s620_s21, [#allocation5] }
   0x3   :  { %18 = dma.hbm_to_smem %s16_s20, 16, %s621_s22, [#allocation5] }
   0x4   :  { %590 = dma.done.wait [#allocation5], 32 }
   0x5   :  { %591 = vsyncadd [#allocation5], 4294967264 }
   0x6   :  { %21 = sfence }
   0x7   :  { %22 = vsyncpa [#allocation9], 0 }
   0x8   :  { %24 = vsyncpa [#allocation9 + $0x1], 0  ;;  %s658_s23 = smov 0   ;;  %s660_s24 = smov 0  }
   0x9   :  { %s662_s0 = smov 0   ;;  %s664_s25 = smov 0  }
   0xa   :  { %s666_s1 = smov 0   ;;  %s668_s26 = smov 0  }
   0xb LB: > { %s425_s27 = sadd.s32 4294967295, %s618_s26   ;;  %s426_s28 = sadd.s32 4294967294, %s618_s26   ;;  %s618_s26 = sphi %s668_s26, %s30_s26   ;;  %s614_s1 = sphi %s666_s1, %s797_s1   ;;  %s610_s25 = sphi %s664_s25, %s796_s25   ;;  %s606_s0 = sphi %s662_s0, %s795_s0   ;;  %s602_s24 = sphi %s660_s24, %s794_s24   ;;  %s598_s23 = sphi %s658_s23, %s793_s23  }
   0xc   : > { %s42_s29 = sadd.s32 1, %s614_s1  ;;  %s113_s30 = sadd.s32 1, %s606_s0 }
   0xd   : > { %p44_p0 = scmp.ge.s32.totalorder %s42_s29, 2  ;;  %p123_p1 = scmp.ne.s32.totalorder %s606_s0, %s602_s24 }
   0xe   : > { %p124_p2 = scmp.eq.s32.totalorder %s425_s27, 1  ;;  %p129_p3 = scmp.ne.s32.totalorder %s602_s24, %s598_s23 }
   0xf   : > { %s799_s29 = smov (%p44_p0, %s42_s29), 0  ;;  %p130_p5 = scmp.eq.s32.totalorder %s426_s28, 1 }
  0x10   : > { %p698_p4 = por %p124_p2, %p123_p1  ;;  %s110_s6 = ssub.s32 %s614_s1, %s799_s29 }
  0x11   : > { %p429_p6 = scmp.ge.s32.totalorder %s618_s26, 1  ;;  %p111_p7 = scmp.eq.s32.totalorder %s110_s6, 0 }
  0x12   : > { %p705_p8 = por %p130_p5, %p129_p3  ;;  %p175_p9 = scmp.lt.s32.totalorder %s618_s26, 3 }
  0x13   : > { %s711_s8 = scalar_select %p111_p7, %s606_s0, %s113_s30  }
  0x14   : > { %p176_p10 = pnand %p429_p6, %p175_p9 }
  0x15   : > { %s205_s9 = sand.u32 (!%p176_p10), 1, %s602_s24   ;;  %s208_s10 = sld [smem:[#allocation6 + %s610_s25]] (!%p176_p10) }
  0x16   : > { %179 = sbr.rel (%p176_p10) target bundleno = 626 (0x272), region = 28  ;;  %s430_s11 = sshll.u32 (!%p176_p10), %s205_s9, 3 }
  0x17   : > { %s223_s12 = sld [smem:[#allocation6 + %s610_s25]] (!%p176_p10)  ;;  %s729_s22 = scalar_lea.vmem (!%p176_p10), [#allocation8], %s430_s11 }
  0x18   : > { %s719_s13 = sld [smem:[#allocation7 + %s610_s25]] (!%p176_p10) }
  0x1b   : > { %p212_p11 = scmp.lt.s32.totalorder %s208_s10, 1 }
  0x1d   : > { %p224_p12 = scmp.lt.s32.totalorder %s223_s12, 1  ;;  %s801_s10 = smov (!%p212_p11, %s208_s10), 1 }
  0x1e   : > { %s431_s14 = sshll.u32 %s801_s10, 3  ;;  %p433_p13 = scmp.le.s32.totalorder %s719_s13, 0 }
  0x1f   : > { %s803_s12 = smov (!%p224_p12, %s223_s12), 1  ;;  %s218_s17 = scalar_lea.vmem %s787_s2, %s431_s14 }
  0x20   : > { %s432_s18 = sshll.u32 %s803_s12, 3  ;;  %233 = sbr.rel (%p433_p13) target bundleno = 401 (0x191), region = 32 }
  0x21   : > { %s727_s21 = scalar_lea.vmem %s788_s3, %s432_s18 }
  0x25   : > { %v242_v0 = vld [vmem:[%s218_s17] sm:$0xff]  ;;  %vm238_vm0 = vcmask 7168   ;;  %v622_v1 = vmov -1e+30   ;;  %v623_v2 = vmov 0   ;;  %v624_v3 = vmov 0.0  }
  0x26   : > { %250 = vmax.xlane.f32.xlu0 %v242_v0  ;;  %239 = vst.msk [vmem:[#allocation2] sm:$0xff] %vm238_vm0, %v622_v1  ;;  %507 = vset.pattern.permute.xlu1 %v623_v2  ;;  %v243_v4 = vld [vmem:[%s727_s21] sm:$0xff]  ;;  %v244_v9 = vlaneseq }
  0x27   : > { %506 = vset.pattern.permute.xlu0 %v623_v2  ;;  %241 = vst.msk [vmem:[#allocation4] sm:$0xff] %vm238_vm0, %v624_v3  ;;  %273 = vperm.xlu1 %507, %v243_v4  }
  0x28   : > { %240 = vst.msk [vmem:[#allocation3] sm:$0xff] %vm238_vm0, %v624_v3  ;;  %v245_v11 = vand.u32 127, %v244_v9 }
  0x2d   : > { %v249_v5 = vld [vmem:[#allocation2] sm:$0xff] }
  0x2e   : > { %v277_v17 = vld [vmem:[#allocation4] sm:$0xff] }
  0x2f   : > { %v264_v22 = vld [vmem:[#allocation3] sm:$0xff] }
  0x99   : > { %v251_v6 = vpop.xlane.xlu0 %250  ;;  %v274_v10 = vpop.permute.xlu1 %273 }
  0x9a   : > { %v252_v7 = vmax.f32 %v249_v5, %v251_v6  ;;  %vm275_vm1 = vcmp.eq.s32.totalorder %v245_v11, %v274_v10 }
  0x9b   : > { %v276_v12 = vsel %vm275_vm1, %v242_v0, 0.0 }
  0x9c   : > { %v253_v8 = vsub.f32 %v249_v5, %v252_v7  ;;  %271 = vst.msk [vmem:[#allocation2] sm:$0xff] %vm238_vm0, %v252_v7  ;;  %258 = vperm.xlu0 %506, %v252_v7   ;;  %278 = vadd.xlane.f32.xlu2 %v276_v12 }
  0x9e   : > { %v254_v20 = vmul.f32 1.442695, %v253_v8 }
 0x10e   : > { %v259_v13 = vpop.permute.xlu0 %258 }
 0x10f   : > { %v261_v14 = vsub.f32 %v242_v0, %v259_v13  ;;  %v279_v18 = vpop.xlane.xlu2 %278 }
 0x110   : > { %v280_v19 = vadd.f32 %v279_v18, %v277_v17 }
 0x111   : > { %v262_v15 = vmul.f32 1.442695, %v261_v14 }
 0x112   : > { %281 = vst.msk [vmem:[#allocation4] sm:$0xff] %vm238_vm0, %v280_v19 }
 0x113   : > { %508 = vpow2.f32 %v262_v15 }
 0x114   : > { %510 = vpow2.f32 %v254_v20 }
 0x119   : > { %v509_v16 = vpop.eup %508 }
 0x11a   : > { %266 = vadd.xlane.f32.xlu1 %v509_v16  ;;  %v511_v21 = vpop.eup %510 }
 0x11b   : > { %v265_v23 = vmul.f32 %v511_v21, %v264_v22 }
 0x18d   : > { %v267_v24 = vpop.xlane.xlu1 %266 }
 0x18e   : > { %v268_v25 = vadd.f32 %v267_v24, %v265_v23 }
 0x190   : > { %270 = vst.msk [vmem:[#allocation3] sm:$0xff] %vm238_vm0, %v268_v25 }
 0x191 PF: > { %v625_v26 = vmov 0.0   ;;  %289 = sbr.rel (%p433_p13) target bundleno = 611 (0x263), region = 44 }
 0x192   : > { %286 = vst [vmem:[%s729_s22] sm:$0xff] %v625_v26 }
 0x196   : > { %v294_v29 = vld [vmem:[#allocation2] sm:$0xff]  ;;  %v296_v32 = vld [vmem:[#allocation4] sm:$0xff]  ;;  %vm300_vm3 = vcmask 7168   ;;  %v626_v37 = vmov 0.0  }
 0x197   : > { %v291_v27 = vld [vmem:[#allocation3] sm:$0xff]  ;;  %v290_v30 = vld [vmem:[%s727_s21] sm:$0xff] }
 0x198   : > { %512 = vlog2.f32 %v291_v27  ;;  %vm298_vm2 = vcmp.ge.s32.totalorder %v290_v30, 0 }
 0x199   : > { %v435_v38 = vsel %vm298_vm2, 1.0, %v626_v37 }
 0x19a   : > { %v313_v39 = vsel %vm300_vm3, %v435_v38, 0.0 }
 0x19e   : > { %v513_v28 = vpop.eup %512 }
 0x19f   : > { %v293_v31 = vmul.f32 0.6931472, %v513_v28 }
 0x1a1   : > { %v295_v33 = vadd.f32 %v294_v29, %v293_v31 }
 0x1a3   : > { %v297_v34 = vsub.f32 %v295_v33, %v296_v32 }
 0x1a5   : > { %v299_v35 = vsel %vm298_vm2, %v297_v34, 0.0 }
 0x1a6   : > { %v301_v36 = vsel %vm300_vm3, %v299_v35, 0.0 }
 0x1a7   : > { %302 = vadd.xlane.f32.xlu0 %v301_v36 }
 0x1af   : > { %314 = vadd.xlane.f32.xlu0 %v313_v39 }
 0x21a   : > { %v303_v40 = vpop.xlane.xlu0 %302 }
 0x21b   : > { %v304_v41 = vrot.slane %v303_v40, 4 }
 0x21d   : > { %v305_v42 = vadd.f32 %v304_v41, %v303_v40 }
 0x21f   : > { %v306_v43 = vrot.slane %v305_v42, 2 }
 0x221   : > { %v307_v44 = vadd.f32 %v306_v43, %v305_v42 }
 0x222   : > { %v315_v45 = vpop.xlane.xlu0 %314 }
 0x223   : > { %v316_v46 = vrot.slane %v315_v45, 4  ;;  %v308_v47 = vrot.slane %v307_v44, 1 }
 0x225   : > { %v317_v48 = vadd.f32 %v316_v46, %v315_v45  ;;  %v309_v49 = vadd.f32 %v308_v47, %v307_v44 }
 0x227   : > { %v318_v50 = vrot.slane %v317_v48, 2  ;;  %440 = vpush %v309_v49 }
 0x229   : > { %v319_v51 = vadd.f32 %v318_v50, %v317_v48 }
 0x22b   : > { %v320_v52 = vrot.slane %v319_v51, 1 }
 0x22d   : > { %v321_v53 = vadd.f32 %v320_v52, %v319_v51 }
 0x22f   : > { %442 = vpush %v321_v53 }
 0x258   : > { %s441_s27 = spop %440 }
 0x259   : > { %v323_v54 = vstv %s441_s27 }
 0x25a   : > { %324 = vst [vmem:[%s729_s22] sm:$0x1] %v323_v54 }
 0x260   : > { %s443_s28 = spop %442 }
 0x261   : > { %v325_v55 = vstv %s443_s28 }
 0x262   : > { %326 = vst [vmem:[%s729_s22 + $0x1] sm:$0x1] %v325_v55 }
 0x263 PF: > { %s437_s30 = sshll.u32 %s610_s25, 3  ;;  %s340_s12 = sshll.u32 %s729_s22, 4  ;;  %s341_s12 = int_to_ptr.vmem [resolvable:$true] %s340_s12 }
 0x264   : > { %s338_s11 = scalar_lea.hbm %s789_s4, %s437_s30  ;;  %s328_s14 = scalar_lea.sflag [#allocation9], %s205_s9 }
 0x265   : > { %s342_s13 = sshll.u32 %s338_s11, 4  ;;  %s558_s25 = scalar_lea.hbm %s789_s4, 16  ;;  %s343_s13 = int_to_ptr.hbm [resolvable:$true] %s342_s13 }
 0x266   : > { %s552_s15 = sshra.s32 %s343_s13, 4  ;;  %s553_s15 = int_to_ptr.hbm [resolvable:$true] %s552_s15 }
 0x267   : > { %s554_s16 = scalar_lea.hbm %s553_s15, 8  ;;  %p559_p3 = scmp.lt.s32.totalorder %s553_s15, %s789_s4 }
 0x268   : > { %p555_p0 = scmp.ne.s32.totalorder %s553_s15, %s554_s16  ;;  %p560_p5 = scmp.lt.s32.totalorder %s558_s25, %s554_s16 }
 0x26a   : > { %p556_p1 = pnand %p555_p0, %p698_p4  ;;  %p561_p6 = por %p560_p5, %p559_p3 }
 0x26c   : > { %p557_p2 = pneg %p556_p1 }
 0x26e   : > { %p562_p7 = pnand %p561_p6, %p557_p2 }
 0x270   : > { %565 = shalt.err (!%p562_p7)
}
 0x271   : > { %444 = dma.vmem_to_hbm [thread:$0]  (%p698_p4), %s341_s12, 128, %s343_s13, %s328_s14  }
 0x272 PF: > { %p450_p9 = scmp.ge.s32.totalorder %s618_s26, 2  ;;  %s354_s9 = sand.u32 1, %s598_s23  }
 0x273   : > { %s355_s21 = scalar_lea.sflag [#allocation9], %s354_s9 }
 0x274   : > { %p447_p10 = pnand %p450_p9, %p705_p8 }
 0x276   : > { %p448_p11 = pneg %p447_p10 }
 0x278   : > { %593 = dma.done.wait (%p448_p11), %s355_s21, 128  }
 0x279   : > { %595 = vsyncadd (%p448_p11), %s355_s21, 4294967168  ;;  %s30_s26 = sadd.s32 1, %s618_s26   ;;  %s793_s23 = smov %s602_s24 }
 0x27a   : > { %p27_p12 = scmp.ge.s32.totalorder %s30_s26, 4   ;;  %s794_s24 = smov %s606_s0 }
 0x27b   : > { %s795_s0 = smov %s711_s8  ;;  %s796_s25 = smov %s614_s1 }
 0x27c   : > { %s797_s1 = smov %s799_s29  ;;  %29 = sbr.rel (!%p27_p12) target bundleno = 11 (0xb), region = 82 }
 0x281   :  { %361 = vsyncpa [#allocation9], 1 }
 0x282   :  { %363 = vsyncpa [#allocation9 + $0x1], 1 }

</bundles_post_ra>
